<compile_context>
chip_gen: v7x
topology: tpu7x:2x2x1
jax: 0.10.0
libtpu: 0.0.40
codegen_flags: <defaults>
</compile_context>

<pallas_src>
import functools

import jax
import jax.numpy as jnp
from jax.experimental import pallas as pl
from jax.experimental.pallas import tpu as pltpu

NUM_CLASSES = 3        # DiceLoss hard-codes labels {0, 1, 2}
DICE_SMOOTH = 1e-5
LANES = 128
SUBLANES = 8
NUM_STATS = 10         # 3x intersect, 3x zsum, 3x ysum, 1x ce-sum


def _round_up(x, m):
    return ((x + m - 1) // m) * m


def _fold(x):
    """(R,128) -> (8,128) via elementwise vreg adds (no cross-lane work)."""
    r = x.shape[0]
    return jnp.sum(x.reshape(r // SUBLANES, SUBLANES, LANES), axis=0)


def _joint_loss_kernel(logits_ref, gt_ref, out_ref, acc_ref):
    # logits_ref: (C, tile_rows, 128) in the input dtype
    # gt_ref:     (tile_rows, 128) int32, -1 marks padded pixels
    # out_ref:    (NUM_STATS, 8, 128) f32 per-batch partial stats
    # acc_ref:    (NUM_STATS, 8, 128) f32 VMEM accumulator
    t = pl.program_id(1)

    @pl.when(t == 0)
    def _():
        acc_ref[...] = jnp.zeros_like(acc_ref)

    g = gt_ref[...]                                   # (R,128) int32
    l0 = logits_ref[0].astype(jnp.float32)            # (R,128)
    l1 = logits_ref[1].astype(jnp.float32)
    l2 = logits_ref[2].astype(jnp.float32)

    valid = jnp.where(g >= 0, 1.0, 0.0)               # padded pixels -> 0
    lab0 = jnp.where(g == 0, 1.0, 0.0)                # one-hot, 0 on padding
    lab1 = jnp.where(g == 1, 1.0, 0.0)
    lab2 = jnp.where(g == 2, 1.0, 0.0)

    # softmax over the 3 classes, fully elementwise (VPU + EUP)
    m = jnp.maximum(jnp.maximum(l0, l1), l2)
    e0 = jnp.exp(l0 - m)
    e1 = jnp.exp(l1 - m)
    e2 = jnp.exp(l2 - m)
    s = e0 + e1 + e2
    inv = pl.reciprocal(s) * valid                    # exact; mask applied once
    p0 = e0 * inv
    p1 = e1 * inv
    p2 = e2 * inv

    # cross-entropy: nll = logsumexp(logits) - logit_at_gt_class
    logit_gt = l0 * lab0 + l1 * lab1 + l2 * lab2
    nll = (m + jnp.log(s) - logit_gt) * valid

    # deferred reductions: fold to a single (8,128) vreg per statistic
    acc_ref[0] += _fold(p0 * lab0)                    # intersect, class 0..2
    acc_ref[1] += _fold(p1 * lab1)
    acc_ref[2] += _fold(p2 * lab2)
    acc_ref[3] += _fold(p0)                           # zsum (pred prob sum)
    acc_ref[4] += _fold(p1)
    acc_ref[5] += _fold(p2)
    acc_ref[6] += _fold(lab0)                         # ysum (label count)
    acc_ref[7] += _fold(lab1)
    acc_ref[8] += _fold(lab2)
    acc_ref[9] += _fold(nll)                          # CE sum

    @pl.when(t == pl.num_programs(1) - 1)
    def _():
        out_ref[...] = acc_ref[...]


@functools.partial(jax.jit, static_argnames=("tile_rows",))
def joint_loss(pred, gt, tile_rows=512):
    """pred: (B, C, H, W) logits, gt: (B, 1, H, W) class ids in {0,1,2}."""
    B, C, H, W = pred.shape
    assert C == NUM_CLASSES
    HW = H * W
    N = B * HW

    # pixel tiling: rows of 128 lanes, tile_rows a multiple of 8
    rows = pl.cdiv(HW, LANES)
    tr = max(SUBLANES, min((tile_rows // SUBLANES) * SUBLANES,
                           _round_up(rows, SUBLANES)))
    rows_pad = _round_up(rows, tr)
    n_pix_pad = rows_pad * LANES
    n_tiles = rows_pad // tr

    # metadata-only reshapes in native NCHW order (pad only if needed)
    logits = pred.reshape(B, C, HW)                   # keep input dtype (bf16 ok)
    gt_i = gt.reshape(B, HW).astype(jnp.int32)
    pad = n_pix_pad - HW
    if pad:
        logits = jnp.pad(logits, ((0, 0), (0, 0), (0, pad)))
        gt_i = jnp.pad(gt_i, ((0, 0), (0, pad)), constant_values=-1)
    logits = logits.reshape(B, C, rows_pad, LANES)
    gt_i = gt_i.reshape(B, rows_pad, LANES)

    n_pad_total = B * n_pix_pad
    cost = pl.CostEstimate(
        flops=40 * n_pad_total,
        transcendentals=5 * n_pad_total,
        bytes_accessed=int(logits.size) * logits.dtype.itemsize
        + int(gt_i.size) * 4
        + B * NUM_STATS * SUBLANES * LANES * 4,
    )

    per_b = pl.pallas_call(
        _joint_loss_kernel,
        out_shape=jax.ShapeDtypeStruct((B, NUM_STATS, SUBLANES, LANES),
                                       jnp.float32),
        grid_spec=pltpu.PrefetchScalarGridSpec(
            num_scalar_prefetch=0,
            grid=(B, n_tiles),
            in_specs=[
                pl.BlockSpec((None, C, tr, LANES), lambda b, i: (b, 0, i, 0)),
                pl.BlockSpec((None, tr, LANES), lambda b, i: (b, i, 0)),
            ],
            out_specs=pl.BlockSpec((None, NUM_STATS, SUBLANES, LANES),
                                   lambda b, i: (b, 0, 0, 0)),
            scratch_shapes=[pltpu.VMEM((NUM_STATS, SUBLANES, LANES),
                                       jnp.float32)],
        ),
        compiler_params=pltpu.CompilerParams(
            dimension_semantics=("parallel", "arbitrary")),
        cost_estimate=cost,
    )(logits, gt_i)

    # tiny final reductions + scalar glue in plain JAX
    stats = jnp.sum(per_b, axis=(0, 2, 3))            # (NUM_STATS,)
    intersect = stats[0:3]
    zsum = stats[3:6]
    ysum = stats[6:9]
    ce_sum = stats[9]

    dice_sum = jnp.sum((2.0 * intersect + DICE_SMOOTH)
                       / (zsum + ysum + DICE_SMOOTH))
    dice_loss = 1.0 - dice_sum / NUM_CLASSES
    ce = ce_sum / N                                   # CrossEntropyLoss mean
    return (ce + dice_loss) / 2.0


def joint_loss_ref(pred, gt):
    """Pure-JAX reference matching the PyTorch JointLoss forward."""
    B, C, H, W = pred.shape
    logits = pred.astype(jnp.float32)
    labels = gt.reshape(B, H, W).astype(jnp.int32)

    logp = jax.nn.log_softmax(logits, axis=1)
    ce = -jnp.mean(jnp.take_along_axis(logp, labels[:, None], axis=1))

    p = jax.nn.softmax(logits, axis=1)
    onehot = jax.nn.one_hot(labels, C, axis=1, dtype=jnp.float32)
    loss = 0.0
    for i in range(C):
        inter = jnp.sum(p[:, i] * onehot[:, i])
        z = jnp.sum(p[:, i])
        y = jnp.sum(onehot[:, i])
        loss += (2.0 * inter + DICE_SMOOTH) / (z + y + DICE_SMOOTH)
    dice = 1.0 - loss / C
    return (ce + dice) / 2.0


if __name__ == "__main__":
    key = jax.random.PRNGKey(0)
    k1, k2 = jax.random.split(key)
    B, C, H, W = 2, NUM_CLASSES, 16, 16
    pred = jax.random.normal(k1, (B, C, H, W), dtype=jnp.float32)
    gt = jax.random.randint(k2, (B, 1, H, W), 0, NUM_CLASSES).astype(jnp.float32)

    out = joint_loss(pred, gt)
    jax.block_until_ready(out)

    ref = joint_loss_ref(pred, gt)
    assert jnp.allclose(out, ref, rtol=1e-4, atol=1e-5), (out, ref)

    print("KERNEL_OK")
</pallas_src>

<mosaic_0001>
module attributes {stable_mosaic.version = 11 : i64} {
  func.func @_joint_loss_kernel(%arg0: i32, %arg1: i32, %arg2: memref<1x3x8x128xf32, #tpu.memory_space<vmem>>, %arg3: memref<1x8x128xi32, #tpu.memory_space<vmem>>, %arg4: memref<1x10x8x128xf32, #tpu.memory_space<vmem>>, %arg5: memref<10x8x128xf32, #tpu.memory_space<vmem>>) attributes {dimension_semantics = [#tpu.dimension_semantics<parallel>, #tpu.dimension_semantics<arbitrary>], iteration_bounds = array<i64: 2, 1>, scalar_prefetch = 0 : i64, scratch_operands = 1 : i64, tpu.core_type = #tpu.core_type<tc>, window_params = [{transform_indices = @transform_0, window_bounds = array<i64: 1, 3, 8, 128>}, {transform_indices = @transform_1, window_bounds = array<i64: 1, 8, 128>}, {transform_indices = @transform_2, window_bounds = array<i64: 1, 10, 8, 128>}]} {
    %c0_i32 = arith.constant 0 : i32
    %0 = arith.cmpi eq, %arg1, %c0_i32 : i32
    %1 = arith.extui %0 : i1 to i32
    %c0_i32_0 = arith.constant 0 : i32
    %2 = arith.cmpi ne, %1, %c0_i32_0 : i32
    scf.if %2 {
      %cst_87 = arith.constant 0.000000e+00 : f32
      %141 = vector.broadcast %cst_87 : f32 to vector<10x8x128xf32>
      %c0_88 = arith.constant 0 : index
      %c0_89 = arith.constant 0 : index
      %c0_90 = arith.constant 0 : index
      %142 = vector.load %arg5[%c0_88, %c0_89, %c0_90] : memref<10x8x128xf32, #tpu.memory_space<vmem>>, vector<10x8x128xf32>
      tpu.vector_store %arg5[%c0_88, %c0_89, %c0_90], %141 {strides = array<i32>} : memref<10x8x128xf32, #tpu.memory_space<vmem>>, vector<10x8x128xf32>,
    } else {
    }
    %c0 = arith.constant 0 : index
    %c0_1 = arith.constant 0 : index
    %c0_2 = arith.constant 0 : index
    %3 = vector.load %arg3[%c0, %c0_1, %c0_2] : memref<1x8x128xi32, #tpu.memory_space<vmem>>, vector<1x8x128xi32>
    %4 = vector.shape_cast %3 : vector<1x8x128xi32> to vector<8x128xi32>
    %c0_3 = arith.constant 0 : index
    %c0_4 = arith.constant 0 : index
    %c0_5 = arith.constant 0 : index
    %c0_6 = arith.constant 0 : index
    %5 = vector.load %arg2[%c0_3, %c0_4, %c0_5, %c0_6] : memref<1x3x8x128xf32, #tpu.memory_space<vmem>>, vector<1x1x8x128xf32>
    %6 = vector.shape_cast %5 : vector<1x1x8x128xf32> to vector<8x128xf32>
    %c0_7 = arith.constant 0 : index
    %c1 = arith.constant 1 : index
    %c0_8 = arith.constant 0 : index
    %c0_9 = arith.constant 0 : index
    %7 = vector.load %arg2[%c0_7, %c1, %c0_8, %c0_9] : memref<1x3x8x128xf32, #tpu.memory_space<vmem>>, vector<1x1x8x128xf32>
    %8 = vector.shape_cast %7 : vector<1x1x8x128xf32> to vector<8x128xf32>
    %c0_10 = arith.constant 0 : index
    %c2 = arith.constant 2 : index
    %c0_11 = arith.constant 0 : index
    %c0_12 = arith.constant 0 : index
    %9 = vector.load %arg2[%c0_10, %c2, %c0_11, %c0_12] : memref<1x3x8x128xf32, #tpu.memory_space<vmem>>, vector<1x1x8x128xf32>
    %10 = vector.shape_cast %9 : vector<1x1x8x128xf32> to vector<8x128xf32>
    %c0_i32_13 = arith.constant 0 : i32
    %11 = vector.broadcast %c0_i32_13 : i32 to vector<8x128xi32>
    %12 = arith.cmpi sge, %4, %11 : vector<8x128xi32>
    %cst = arith.constant 1.000000e+00 : f32
    %cst_14 = arith.constant 0.000000e+00 : f32
    %13 = vector.broadcast %cst : f32 to vector<8x128xf32>
    %14 = vector.broadcast %cst_14 : f32 to vector<8x128xf32>
    %15 = arith.select %12, %13, %14 : vector<8x128xi1>, vector<8x128xf32>
    %c0_i32_15 = arith.constant 0 : i32
    %16 = vector.broadcast %c0_i32_15 : i32 to vector<8x128xi32>
    %17 = arith.cmpi eq, %4, %16 : vector<8x128xi32>
    %cst_16 = arith.constant 1.000000e+00 : f32
    %cst_17 = arith.constant 0.000000e+00 : f32
    %18 = vector.broadcast %cst_16 : f32 to vector<8x128xf32>
    %19 = vector.broadcast %cst_17 : f32 to vector<8x128xf32>
    %20 = arith.select %17, %18, %19 : vector<8x128xi1>, vector<8x128xf32>
    %c1_i32 = arith.constant 1 : i32
    %21 = vector.broadcast %c1_i32 : i32 to vector<8x128xi32>
    %22 = arith.cmpi eq, %4, %21 : vector<8x128xi32>
    %cst_18 = arith.constant 1.000000e+00 : f32
    %cst_19 = arith.constant 0.000000e+00 : f32
    %23 = vector.broadcast %cst_18 : f32 to vector<8x128xf32>
    %24 = vector.broadcast %cst_19 : f32 to vector<8x128xf32>
    %25 = arith.select %22, %23, %24 : vector<8x128xi1>, vector<8x128xf32>
    %c2_i32 = arith.constant 2 : i32
    %26 = vector.broadcast %c2_i32 : i32 to vector<8x128xi32>
    %27 = arith.cmpi eq, %4, %26 : vector<8x128xi32>
    %cst_20 = arith.constant 1.000000e+00 : f32
    %cst_21 = arith.constant 0.000000e+00 : f32
    %28 = vector.broadcast %cst_20 : f32 to vector<8x128xf32>
    %29 = vector.broadcast %cst_21 : f32 to vector<8x128xf32>
    %30 = arith.select %27, %28, %29 : vector<8x128xi1>, vector<8x128xf32>
    %31 = arith.maximumf %6, %8 : vector<8x128xf32>
    %32 = arith.maximumf %31, %10 : vector<8x128xf32>
    %33 = arith.subf %6, %32 : vector<8x128xf32>
    %34 = math.exp %33 : vector<8x128xf32>
    %35 = arith.subf %8, %32 : vector<8x128xf32>
    %36 = math.exp %35 : vector<8x128xf32>
    %37 = arith.subf %10, %32 : vector<8x128xf32>
    %38 = math.exp %37 : vector<8x128xf32>
    %39 = arith.addf %34, %36 : vector<8x128xf32>
    %40 = arith.addf %39, %38 : vector<8x128xf32>
    %41 = tpu.reciprocal %40 : vector<8x128xf32> -> vector<8x128xf32>
    %42 = arith.mulf %41, %15 : vector<8x128xf32>
    %43 = arith.mulf %34, %42 : vector<8x128xf32>
    %44 = arith.mulf %36, %42 : vector<8x128xf32>
    %45 = arith.mulf %38, %42 : vector<8x128xf32>
    %46 = arith.mulf %6, %20 : vector<8x128xf32>
    %47 = arith.mulf %8, %25 : vector<8x128xf32>
    %48 = arith.addf %46, %47 : vector<8x128xf32>
    %49 = arith.mulf %10, %30 : vector<8x128xf32>
    %50 = arith.addf %48, %49 : vector<8x128xf32>
    %51 = math.log %40 : vector<8x128xf32>
    %52 = arith.addf %32, %51 : vector<8x128xf32>
    %53 = arith.subf %52, %50 : vector<8x128xf32>
    %54 = arith.mulf %53, %15 : vector<8x128xf32>
    %c0_22 = arith.constant 0 : index
    %c0_23 = arith.constant 0 : index
    %c0_24 = arith.constant 0 : index
    %55 = vector.load %arg5[%c0_22, %c0_23, %c0_24] : memref<10x8x128xf32, #tpu.memory_space<vmem>>, vector<1x8x128xf32>
    %56 = vector.shape_cast %55 : vector<1x8x128xf32> to vector<8x128xf32>
    %57 = arith.mulf %43, %20 : vector<8x128xf32>
    %58 = vector.shape_cast %57 : vector<8x128xf32> to vector<1x8x128xf32>
    %cst_25 = arith.constant dense<0.000000e+00> : vector<8x128xf32>
    %59 = vector.multi_reduction <add>, %58, %cst_25 [0] : vector<1x8x128xf32> to vector<8x128xf32>
    %60 = arith.addf %56, %59 : vector<8x128xf32>
    %c0_26 = arith.constant 0 : index
    %c0_27 = arith.constant 0 : index
    %c0_28 = arith.constant 0 : index
    %61 = vector.load %arg5[%c0_26, %c0_27, %c0_28] : memref<10x8x128xf32, #tpu.memory_space<vmem>>, vector<1x8x128xf32>
    %62 = vector.shape_cast %61 : vector<1x8x128xf32> to vector<8x128xf32>
    %63 = vector.shape_cast %60 : vector<8x128xf32> to vector<1x8x128xf32>
    tpu.vector_store %arg5[%c0_26, %c0_27, %c0_28], %63 {strides = array<i32>} : memref<10x8x128xf32, #tpu.memory_space<vmem>>, vector<1x8x128xf32>,
    %c1_29 = arith.constant 1 : index
    %c0_30 = arith.constant 0 : index
    %c0_31 = arith.constant 0 : index
    %64 = vector.load %arg5[%c1_29, %c0_30, %c0_31] : memref<10x8x128xf32, #tpu.memory_space<vmem>>, vector<1x8x128xf32>
    %65 = vector.shape_cast %64 : vector<1x8x128xf32> to vector<8x128xf32>
    %66 = arith.mulf %44, %25 : vector<8x128xf32>
    %67 = vector.shape_cast %66 : vector<8x128xf32> to vector<1x8x128xf32>
    %cst_32 = arith.constant dense<0.000000e+00> : vector<8x128xf32>
    %68 = vector.multi_reduction <add>, %67, %cst_32 [0] : vector<1x8x128xf32> to vector<8x128xf32>
    %69 = arith.addf %65, %68 : vector<8x128xf32>
    %c1_33 = arith.constant 1 : index
    %c0_34 = arith.constant 0 : index
    %c0_35 = arith.constant 0 : index
    %70 = vector.load %arg5[%c1_33, %c0_34, %c0_35] : memref<10x8x128xf32, #tpu.memory_space<vmem>>, vector<1x8x128xf32>
    %71 = vector.shape_cast %70 : vector<1x8x128xf32> to vector<8x128xf32>
    %72 = vector.shape_cast %69 : vector<8x128xf32> to vector<1x8x128xf32>
    tpu.vector_store %arg5[%c1_33, %c0_34, %c0_35], %72 {strides = array<i32>} : memref<10x8x128xf32, #tpu.memory_space<vmem>>, vector<1x8x128xf32>,
    %c2_36 = arith.constant 2 : index
    %c0_37 = arith.constant 0 : index
    %c0_38 = arith.constant 0 : index
    %73 = vector.load %arg5[%c2_36, %c0_37, %c0_38] : memref<10x8x128xf32, #tpu.memory_space<vmem>>, vector<1x8x128xf32>
    %74 = vector.shape_cast %73 : vector<1x8x128xf32> to vector<8x128xf32>
    %75 = arith.mulf %45, %30 : vector<8x128xf32>
    %76 = vector.shape_cast %75 : vector<8x128xf32> to vector<1x8x128xf32>
    %cst_39 = arith.constant dense<0.000000e+00> : vector<8x128xf32>
    %77 = vector.multi_reduction <add>, %76, %cst_39 [0] : vector<1x8x128xf32> to vector<8x128xf32>
    %78 = arith.addf %74, %77 : vector<8x128xf32>
    %c2_40 = arith.constant 2 : index
    %c0_41 = arith.constant 0 : index
    %c0_42 = arith.constant 0 : index
    %79 = vector.load %arg5[%c2_40, %c0_41, %c0_42] : memref<10x8x128xf32, #tpu.memory_space<vmem>>, vector<1x8x128xf32>
    %80 = vector.shape_cast %79 : vector<1x8x128xf32> to vector<8x128xf32>
    %81 = vector.shape_cast %78 : vector<8x128xf32> to vector<1x8x128xf32>
    tpu.vector_store %arg5[%c2_40, %c0_41, %c0_42], %81 {strides = array<i32>} : memref<10x8x128xf32, #tpu.memory_space<vmem>>, vector<1x8x128xf32>,
    %c3 = arith.constant 3 : index
    %c0_43 = arith.constant 0 : index
    %c0_44 = arith.constant 0 : index
    %82 = vector.load %arg5[%c3, %c0_43, %c0_44] : memref<10x8x128xf32, #tpu.memory_space<vmem>>, vector<1x8x128xf32>
    %83 = vector.shape_cast %82 : vector<1x8x128xf32> to vector<8x128xf32>
    %84 = vector.shape_cast %43 : vector<8x128xf32> to vector<1x8x128xf32>
    %cst_45 = arith.constant dense<0.000000e+00> : vector<8x128xf32>
    %85 = vector.multi_reduction <add>, %84, %cst_45 [0] : vector<1x8x128xf32> to vector<8x128xf32>
    %86 = arith.addf %83, %85 : vector<8x128xf32>
    %c3_46 = arith.constant 3 : index
    %c0_47 = arith.constant 0 : index
    %c0_48 = arith.constant 0 : index
    %87 = vector.load %arg5[%c3_46, %c0_47, %c0_48] : memref<10x8x128xf32, #tpu.memory_space<vmem>>, vector<1x8x128xf32>
    %88 = vector.shape_cast %87 : vector<1x8x128xf32> to vector<8x128xf32>
    %89 = vector.shape_cast %86 : vector<8x128xf32> to vector<1x8x128xf32>
    tpu.vector_store %arg5[%c3_46, %c0_47, %c0_48], %89 {strides = array<i32>} : memref<10x8x128xf32, #tpu.memory_space<vmem>>, vector<1x8x128xf32>,
    %c4 = arith.constant 4 : index
    %c0_49 = arith.constant 0 : index
    %c0_50 = arith.constant 0 : index
    %90 = vector.load %arg5[%c4, %c0_49, %c0_50] : memref<10x8x128xf32, #tpu.memory_space<vmem>>, vector<1x8x128xf32>
    %91 = vector.shape_cast %90 : vector<1x8x128xf32> to vector<8x128xf32>
    %92 = vector.shape_cast %44 : vector<8x128xf32> to vector<1x8x128xf32>
    %cst_51 = arith.constant dense<0.000000e+00> : vector<8x128xf32>
    %93 = vector.multi_reduction <add>, %92, %cst_51 [0] : vector<1x8x128xf32> to vector<8x128xf32>
    %94 = arith.addf %91, %93 : vector<8x128xf32>
    %c4_52 = arith.constant 4 : index
    %c0_53 = arith.constant 0 : index
    %c0_54 = arith.constant 0 : index
    %95 = vector.load %arg5[%c4_52, %c0_53, %c0_54] : memref<10x8x128xf32, #tpu.memory_space<vmem>>, vector<1x8x128xf32>
    %96 = vector.shape_cast %95 : vector<1x8x128xf32> to vector<8x128xf32>
    %97 = vector.shape_cast %94 : vector<8x128xf32> to vector<1x8x128xf32>
    tpu.vector_store %arg5[%c4_52, %c0_53, %c0_54], %97 {strides = array<i32>} : memref<10x8x128xf32, #tpu.memory_space<vmem>>, vector<1x8x128xf32>,
    %c5 = arith.constant 5 : index
    %c0_55 = arith.constant 0 : index
    %c0_56 = arith.constant 0 : index
    %98 = vector.load %arg5[%c5, %c0_55, %c0_56] : memref<10x8x128xf32, #tpu.memory_space<vmem>>, vector<1x8x128xf32>
    %99 = vector.shape_cast %98 : vector<1x8x128xf32> to vector<8x128xf32>
    %100 = vector.shape_cast %45 : vector<8x128xf32> to vector<1x8x128xf32>
    %cst_57 = arith.constant dense<0.000000e+00> : vector<8x128xf32>
    %101 = vector.multi_reduction <add>, %100, %cst_57 [0] : vector<1x8x128xf32> to vector<8x128xf32>
    %102 = arith.addf %99, %101 : vector<8x128xf32>
    %c5_58 = arith.constant 5 : index
    %c0_59 = arith.constant 0 : index
    %c0_60 = arith.constant 0 : index
    %103 = vector.load %arg5[%c5_58, %c0_59, %c0_60] : memref<10x8x128xf32, #tpu.memory_space<vmem>>, vector<1x8x128xf32>
    %104 = vector.shape_cast %103 : vector<1x8x128xf32> to vector<8x128xf32>
    %105 = vector.shape_cast %102 : vector<8x128xf32> to vector<1x8x128xf32>
    tpu.vector_store %arg5[%c5_58, %c0_59, %c0_60], %105 {strides = array<i32>} : memref<10x8x128xf32, #tpu.memory_space<vmem>>, vector<1x8x128xf32>,
    %c6 = arith.constant 6 : index
    %c0_61 = arith.constant 0 : index
    %c0_62 = arith.constant 0 : index
    %106 = vector.load %arg5[%c6, %c0_61, %c0_62] : memref<10x8x128xf32, #tpu.memory_space<vmem>>, vector<1x8x128xf32>
    %107 = vector.shape_cast %106 : vector<1x8x128xf32> to vector<8x128xf32>
    %108 = vector.shape_cast %20 : vector<8x128xf32> to vector<1x8x128xf32>
    %cst_63 = arith.constant dense<0.000000e+00> : vector<8x128xf32>
    %109 = vector.multi_reduction <add>, %108, %cst_63 [0] : vector<1x8x128xf32> to vector<8x128xf32>
    %110 = arith.addf %107, %109 : vector<8x128xf32>
    %c6_64 = arith.constant 6 : index
    %c0_65 = arith.constant 0 : index
    %c0_66 = arith.constant 0 : index
    %111 = vector.load %arg5[%c6_64, %c0_65, %c0_66] : memref<10x8x128xf32, #tpu.memory_space<vmem>>, vector<1x8x128xf32>
    %112 = vector.shape_cast %111 : vector<1x8x128xf32> to vector<8x128xf32>
    %113 = vector.shape_cast %110 : vector<8x128xf32> to vector<1x8x128xf32>
    tpu.vector_store %arg5[%c6_64, %c0_65, %c0_66], %113 {strides = array<i32>} : memref<10x8x128xf32, #tpu.memory_space<vmem>>, vector<1x8x128xf32>,
    %c7 = arith.constant 7 : index
    %c0_67 = arith.constant 0 : index
    %c0_68 = arith.constant 0 : index
    %114 = vector.load %arg5[%c7, %c0_67, %c0_68] : memref<10x8x128xf32, #tpu.memory_space<vmem>>, vector<1x8x128xf32>
    %115 = vector.shape_cast %114 : vector<1x8x128xf32> to vector<8x128xf32>
    %116 = vector.shape_cast %25 : vector<8x128xf32> to vector<1x8x128xf32>
    %cst_69 = arith.constant dense<0.000000e+00> : vector<8x128xf32>
    %117 = vector.multi_reduction <add>, %116, %cst_69 [0] : vector<1x8x128xf32> to vector<8x128xf32>
    %118 = arith.addf %115, %117 : vector<8x128xf32>
    %c7_70 = arith.constant 7 : index
    %c0_71 = arith.constant 0 : index
    %c0_72 = arith.constant 0 : index
    %119 = vector.load %arg5[%c7_70, %c0_71, %c0_72] : memref<10x8x128xf32, #tpu.memory_space<vmem>>, vector<1x8x128xf32>
    %120 = vector.shape_cast %119 : vector<1x8x128xf32> to vector<8x128xf32>
    %121 = vector.shape_cast %118 : vector<8x128xf32> to vector<1x8x128xf32>
    tpu.vector_store %arg5[%c7_70, %c0_71, %c0_72], %121 {strides = array<i32>} : memref<10x8x128xf32, #tpu.memory_space<vmem>>, vector<1x8x128xf32>,
    %c8 = arith.constant 8 : index
    %c0_73 = arith.constant 0 : index
    %c0_74 = arith.constant 0 : index
    %122 = vector.load %arg5[%c8, %c0_73, %c0_74] : memref<10x8x128xf32, #tpu.memory_space<vmem>>, vector<1x8x128xf32>
    %123 = vector.shape_cast %122 : vector<1x8x128xf32> to vector<8x128xf32>
    %124 = vector.shape_cast %30 : vector<8x128xf32> to vector<1x8x128xf32>
    %cst_75 = arith.constant dense<0.000000e+00> : vector<8x128xf32>
    %125 = vector.multi_reduction <add>, %124, %cst_75 [0] : vector<1x8x128xf32> to vector<8x128xf32>
    %126 = arith.addf %123, %125 : vector<8x128xf32>
    %c8_76 = arith.constant 8 : index
    %c0_77 = arith.constant 0 : index
    %c0_78 = arith.constant 0 : index
    %127 = vector.load %arg5[%c8_76, %c0_77, %c0_78] : memref<10x8x128xf32, #tpu.memory_space<vmem>>, vector<1x8x128xf32>
    %128 = vector.shape_cast %127 : vector<1x8x128xf32> to vector<8x128xf32>
    %129 = vector.shape_cast %126 : vector<8x128xf32> to vector<1x8x128xf32>
    tpu.vector_store %arg5[%c8_76, %c0_77, %c0_78], %129 {strides = array<i32>} : memref<10x8x128xf32, #tpu.memory_space<vmem>>, vector<1x8x128xf32>,
    %c9 = arith.constant 9 : index
    %c0_79 = arith.constant 0 : index
    %c0_80 = arith.constant 0 : index
    %130 = vector.load %arg5[%c9, %c0_79, %c0_80] : memref<10x8x128xf32, #tpu.memory_space<vmem>>, vector<1x8x128xf32>
    %131 = vector.shape_cast %130 : vector<1x8x128xf32> to vector<8x128xf32>
    %132 = vector.shape_cast %54 : vector<8x128xf32> to vector<1x8x128xf32>
    %cst_81 = arith.constant dense<0.000000e+00> : vector<8x128xf32>
    %133 = vector.multi_reduction <add>, %132, %cst_81 [0] : vector<1x8x128xf32> to vector<8x128xf32>
    %134 = arith.addf %131, %133 : vector<8x128xf32>
    %c9_82 = arith.constant 9 : index
    %c0_83 = arith.constant 0 : index
    %c0_84 = arith.constant 0 : index
    %135 = vector.load %arg5[%c9_82, %c0_83, %c0_84] : memref<10x8x128xf32, #tpu.memory_space<vmem>>, vector<1x8x128xf32>
    %136 = vector.shape_cast %135 : vector<1x8x128xf32> to vector<8x128xf32>
    %137 = vector.shape_cast %134 : vector<8x128xf32> to vector<1x8x128xf32>
    tpu.vector_store %arg5[%c9_82, %c0_83, %c0_84], %137 {strides = array<i32>} : memref<10x8x128xf32, #tpu.memory_space<vmem>>, vector<1x8x128xf32>,
    %c0_i32_85 = arith.constant 0 : i32
    %138 = arith.cmpi eq, %arg1, %c0_i32_85 : i32
    %139 = arith.extui %138 : i1 to i32
    %c0_i32_86 = arith.constant 0 : i32
    %140 = arith.cmpi ne, %139, %c0_i32_86 : i32
    scf.if %140 {
      %c0_87 = arith.constant 0 : index
      %c0_88 = arith.constant 0 : index
      %c0_89 = arith.constant 0 : index
      %141 = vector.load %arg5[%c0_87, %c0_88, %c0_89] : memref<10x8x128xf32, #tpu.memory_space<vmem>>, vector<10x8x128xf32>
      %c0_90 = arith.constant 0 : index
      %c0_91 = arith.constant 0 : index
      %c0_92 = arith.constant 0 : index
      %c0_93 = arith.constant 0 : index
      %142 = vector.load %arg4[%c0_90, %c0_91, %c0_92, %c0_93] : memref<1x10x8x128xf32, #tpu.memory_space<vmem>>, vector<1x10x8x128xf32>
      %143 = vector.shape_cast %142 : vector<1x10x8x128xf32> to vector<10x8x128xf32>
      %144 = vector.shape_cast %141 : vector<10x8x128xf32> to vector<1x10x8x128xf32>
      tpu.vector_store %arg4[%c0_90, %c0_91, %c0_92, %c0_93], %144 {strides = array<i32>} : memref<1x10x8x128xf32, #tpu.memory_space<vmem>>, vector<1x10x8x128xf32>,
    } else {
    }
    return
  }
  func.func @transform_0(%arg0: i32, %arg1: i32) -> (i32, i32, i32, i32) {
    %c0_i32 = arith.constant 0 : i32
    %c0_i32_0 = arith.constant 0 : i32
    %c0_i32_1 = arith.constant 0 : i32
    return %arg0, %c0_i32, %arg1, %c0_i32_0 : i32, i32, i32, i32
  }
  func.func @transform_1(%arg0: i32, %arg1: i32) -> (i32, i32, i32) {
    %c0_i32 = arith.constant 0 : i32
    %c0_i32_0 = arith.constant 0 : i32
    return %arg0, %arg1, %c0_i32 : i32, i32, i32
  }
  func.func @transform_2(%arg0: i32, %arg1: i32) -> (i32, i32, i32, i32) {
    %c0_i32 = arith.constant 0 : i32
    %c0_i32_0 = arith.constant 0 : i32
    %c0_i32_1 = arith.constant 0 : i32
    %c0_i32_2 = arith.constant 0 : i32
    return %arg0, %c0_i32, %c0_i32_0, %c0_i32_1 : i32, i32, i32, i32
  }
}

</mosaic_0001>

<bundles_post_ra>
// kernel: joint_loss.1
= control target key start
LH: loop header
LB: loop body
LE: loop exit
PB: predicated region body
PF: predicated region fallthrough
CT: control target
= control target key end

     0   :  { %s499_s9 = smov 0   ;;  %s501_s10 = smov 0   ;;  %s547_s0 = inlined_call_operand.vmem [shape: f32[2,3,8,128], index: 0, kind: input, shape index: {}]   ;;  %s548_s1 = inlined_call_operand.vmem [shape: s32[2,8,128], index: 1, kind: input, shape index: {}]   ;;  %s549_s2 = inlined_call_operand.vmem [shape: f32[2,10,8,128], index: 2, kind: output, shape index: {}]  }
   0x1   :  { %s503_s11 = smov 0  }
   0x2 LB: > { %s24_s12 = sadd.s32 1, %s477_s10  ;;  %p414_p0 = scmp.ge.s32.totalorder %s481_s11, 1  ;;  %s481_s11 = sphi %s503_s11, %s12_s11   ;;  %s477_s10 = sphi %s501_s10, %s551_s10   ;;  %s473_s9 = sphi %s499_s9, %s550_s9  }
   0x3   : > { %p26_p1 = scmp.ge.s32.totalorder %s24_s12, 2  ;;  %p143_p2 = scmp.lt.s32.totalorder %s481_s11, 3 }
   0x5   : > { %s553_s12 = smov (%p26_p1, %s24_s12), 0  ;;  %p144_p3 = pnand %p414_p0, %p143_p2 }
   0x6   : > { %p175_p4 = scmp.lt.s32.totalorder (!%p144_p3), %s473_s9, 1  ;;  %v483_v4 = vmov (!%p144_p3), 0.0  }
   0x7   : > { %147 = sbr.rel (%p144_p3) target bundleno = 64 (0x40), region = 28 }
   0xe   : > { %s555_s9 = smov (!%p175_p4, %s473_s9), 1 }
   0xf   : > { %s422_s13 = smul.u32 24, %s555_s9  ;;  %s416_s14 = sshll.u32 %s555_s9, 3 }
  0x10   : > { %s189_s17 = scalar_lea.vmem %s548_s1, %s416_s14  ;;  %s423_s18 = smul.u32 80, %s555_s9 }
  0x11   : > { %s182_s21 = scalar_lea.vmem %s547_s0, %s422_s13  ;;  %v209_v0 = vld [vmem:[%s189_s17] sm:$0xff] }
  0x12   : > { %s526_s24 = scalar_lea.vmem %s549_s2, %s423_s18  ;;  %v210_v1 = vld [vmem:[%s182_s21] sm:$0xff]  ;;  %v418_v2 = vld [vmem:[%s182_s21 + $0x8] sm:$0xff]  ;;  %v419_v3 = vld [vmem:[%s182_s21 + $0x10] sm:$0xff]  ;;  %vm217_vm0 = vcmp.eq.s32.totalorder %v209_v0, 0  ;;  %vm219_vm1 = vcmp.eq.s32.totalorder %v209_v0, 1  ;;  %vm221_vm2 = vcmp.eq.s32.totalorder %v209_v0, 2 }
  0x13   : > { %v218_v5 = vsel %vm217_vm0, 1.0, %v483_v4  ;;  %v223_v6 = vmax.f32 %v210_v1, %v418_v2  ;;  %v220_v7 = vsel %vm219_vm1, 1.0, %v483_v4  ;;  %v222_v9 = vsel %vm221_vm2, 1.0, %v483_v4 }
  0x14   : > { %322 = vst [vmem:[%s526_s24 + $0x30] sm:$0xff] %v218_v5  ;;  %323 = vst [vmem:[%s526_s24 + $0x38] sm:$0xff] %v220_v7  ;;  %v241_v21 = vmul.f32 %v218_v5, %v210_v1  ;;  %v242_v22 = vmul.f32 %v418_v2, %v220_v7  ;;  %vm215_vm3 = vcmp.ge.s32.totalorder %v209_v0, 0  ;;  %v244_v24 = vmul.f32 %v419_v3, %v222_v9 }
  0x15   : > { %v224_v8 = vmax.f32 %v223_v6, %v419_v3  ;;  %324 = vst [vmem:[%s526_s24 + $0x40] sm:$0xff] %v222_v9  ;;  %v216_v23 = vsel %vm215_vm3, 1.0, %v483_v4 }
  0x16   : > { %v243_v25 = vadd.f32 %v242_v22, %v241_v21 }
  0x17   : > { %v225_v10 = vsub.f32 %v210_v1, %v224_v8  ;;  %v228_v11 = vsub.f32 %v418_v2, %v224_v8  ;;  %v231_v12 = vsub.f32 %v419_v3, %v224_v8 }
  0x18   : > { %v245_v29 = vadd.f32 %v244_v24, %v243_v25 }
  0x19   : > { %v226_v13 = vmul.f32 1.442695, %v225_v10  ;;  %v229_v14 = vmul.f32 1.442695, %v228_v11  ;;  %v232_v15 = vmul.f32 1.442695, %v231_v12 }
  0x1b   : > { %449 = vpow2.f32 %v226_v13 }
  0x1c   : > { %451 = vpow2.f32 %v229_v14 }
  0x1d   : > { %453 = vpow2.f32 %v232_v15 }
  0x25   : > { %v450_v16 = vpop.eup %449 }
  0x26   : > { %v452_v17 = vpop.eup %451 }
  0x27   : > { %v454_v18 = vpop.eup %453  ;;  %v234_v19 = vadd.f32 %v452_v17, %v450_v16 }
  0x29   : > { %v235_v20 = vadd.f32 %v454_v18, %v234_v19 }
  0x2b   : > { %455 = vrcp.f32 %v235_v20 }
  0x2c   : > { %457 = vlog2.f32 %v235_v20 }
  0x35   : > { %v456_v26 = vpop.eup %455 }
  0x36   : > { %v458_v27 = vpop.eup %457  ;;  %v237_v28 = vmul.f32 %v456_v26, %v216_v23 }
  0x37   : > { %v247_v30 = vmul.f32 0.6931472, %v458_v27 }
  0x38   : > { %v238_v31 = vmul.f32 %v450_v16, %v237_v28  ;;  %v239_v32 = vmul.f32 %v452_v17, %v237_v28  ;;  %v240_v33 = vmul.f32 %v454_v18, %v237_v28 }
  0x39   : > { %v248_v34 = vadd.f32 %v247_v30, %v224_v8 }
  0x3a   : > { %v252_v35 = vmul.f32 %v238_v31, %v218_v5  ;;  %319 = vst [vmem:[%s526_s24 + $0x18] sm:$0xff] %v238_v31  ;;  %v258_v36 = vmul.f32 %v239_v32, %v220_v7  ;;  %320 = vst [vmem:[%s526_s24 + $0x20] sm:$0xff] %v239_v32  ;;  %v264_v37 = vmul.f32 %v240_v33, %v222_v9 }
  0x3b   : > { %321 = vst [vmem:[%s526_s24 + $0x28] sm:$0xff] %v240_v33  ;;  %v249_v38 = vsub.f32 %v248_v34, %v245_v29 }
  0x3c   : > { %316 = vst [vmem:[%s526_s24] sm:$0xff] %v252_v35  ;;  %317 = vst [vmem:[%s526_s24 + $0x8] sm:$0xff] %v258_v36 }
  0x3d   : > { %318 = vst [vmem:[%s526_s24 + $0x10] sm:$0xff] %v264_v37  ;;  %v250_v39 = vmul.f32 %v249_v38, %v216_v23 }
  0x3f   : > { %325 = vst [vmem:[%s526_s24 + $0x48] sm:$0xff] %v250_v39 }
  0x40 PF: > { %s12_s11 = sadd.s32 1, %s481_s11   ;;  %s550_s9 = smov %s477_s10 }
  0x41   : > { %p9_p5 = scmp.ge.s32.totalorder %s12_s11, 4   ;;  %s551_s10 = smov %s553_s12 }
  0x43   :  { %11 = sbr.rel (!%p9_p5) target bundleno = 2 (0x2), region = 80 }

</bundles_post_ra>
